<compile_context>
chip_gen: v5e
topology: v5e:2x2
jax: 0.10.0
libtpu: 0.0.40
codegen_flags: <defaults>
</compile_context>

<pallas_src>
import jax
import jax.numpy as jnp
from jax import lax
from jax.experimental import pallas as pl
from jax.experimental.pallas import tpu as pltpu  # noqa: F401  (TPU backend)


# ------------------------- model hyper-parameters ------------------------- #
BATCH = 2
BLOCK_SIZE = 8          # T (sequence length)
EMBED_SIZE = 32         # E
NUM_HEADS = 4
HEAD_SIZE = EMBED_SIZE // NUM_HEADS     # 8
WIDE_FACTOR = 4
HIDDEN = WIDE_FACTOR * EMBED_SIZE       # 128
LN_EPS = 1e-5
NEG_INF = -1e30

BT = BATCH * BLOCK_SIZE                 # flattened token count (16)
LOG2_T = BLOCK_SIZE.bit_length() - 1
assert (1 << LOG2_T) == BLOCK_SIZE      # power-of-two T -> shift/mask in-kernel
assert 4 * EMBED_SIZE == HIDDEN         # small-param packing assumes this


# ------------------------------- the kernel ------------------------------- #
def _layernorm(x, gamma, beta):
    mu = jnp.mean(x, axis=-1, keepdims=True)
    var = jnp.mean((x - mu) ** 2, axis=-1, keepdims=True)
    return (x - mu) * lax.rsqrt(var + LN_EPS) * gamma + beta


def block_kernel(x_ref,        # (BT, E)        flattened tokens
                 wbig_ref,     # (E, HIDDEN + 2E + NH*E) = (32, 320)
                               #   cols [0:128)   -> w1   (FF in)
                               #   cols [128:160) -> wq
                               #   cols [160:192) -> wk
                               #   cols [192:320) -> per-head (wv_h @ wproj_h)
                 w2_ref,       # (HIDDEN, E)    FF out
                 small_ref,    # (8, HIDDEN) packed small params
                               #   row 0          -> b1 (FF-in bias, 128 wide)
                               #   row 1 [0:32)   -> bproj
                               #   row 1 [32:64)  -> ln1_g
                               #   row 1 [64:96)  -> ln1_b
                               #   row 1 [96:128) -> b2 (FF-out bias)
                               #   row 2 [0:32)   -> ln2_g
                               #   row 2 [32:64)  -> ln2_b
                 out_ref):     # (BT, E)
    E, H, NH, T, HDN = EMBED_SIZE, HEAD_SIZE, NUM_HEADS, BLOCK_SIZE, HIDDEN

    x = x_ref[...]                                          # (BT, E) f32

    # ---- unpack small parameters (static slices, tiny) ----
    small = small_ref[...]                                  # (8, HDN)
    b1    = small[0:1, :]                                   # (1, HDN)
    bproj = small[1:2, 0 * E:1 * E]
    g1    = small[1:2, 1 * E:2 * E]
    b1ln  = small[1:2, 2 * E:3 * E]
    b2    = small[1:2, 3 * E:4 * E]
    g2    = small[2:3, 0 * E:1 * E]
    b2ln  = small[2:3, 1 * E:2 * E]

    # ---- block-diagonal causal additive mask, built in-kernel (no DMA) ----
    row = lax.broadcasted_iota(jnp.int32, (BT, BT), 0)
    col = lax.broadcasted_iota(jnp.int32, (BT, BT), 1)
    same_seq = jnp.right_shift(row, LOG2_T) == jnp.right_shift(col, LOG2_T)
    causal = jnp.bitwise_and(col, T - 1) <= jnp.bitwise_and(row, T - 1)
    bias = jnp.where(same_seq & causal, 0.0, NEG_INF).astype(jnp.float32)

    # ---- fused [q | k | (v @ Wproj)_heads] projection (single MXU push) ----
    qkvp = jnp.dot(x, wbig_ref[:, HDN:],
                   preferred_element_type=jnp.float32)      # (BT, 2E + NH*E)
    scale = 1.0 / (H ** 0.5)
    q = qkvp[:, 0:E] * scale                                # fold scale into q
    k = qkvp[:, E:2 * E]

    # ---- multi-head causal attention; Wproj already folded into v' ----
    att = None
    for h in range(NH):                                     # NH = 4, unrolled
        sl = slice(h * H, (h + 1) * H)
        s = lax.dot_general(q[:, sl], k[:, sl],
                            (((1,), (1,)), ((), ())),       # q_h @ k_h.T
                            preferred_element_type=jnp.float32)     # (BT, BT)
        s = s + bias
        s = s - jnp.max(s, axis=-1, keepdims=True)
        p = jnp.exp(s)
        p = p / jnp.sum(p, axis=-1, keepdims=True)          # exact divide
        vp_h = qkvp[:, 2 * E + h * E: 2 * E + (h + 1) * E]  # (BT, E)
        contrib = jnp.dot(p, vp_h, preferred_element_type=jnp.float32)
        att = contrib if att is None else att + contrib
    att = att + bproj

    # ---- residual + LayerNorm1 ----
    x1 = _layernorm(x + att, g1, b1ln)

    # ---- feed-forward E -> 4E -> E, ReLU (dropout = 0.0 is a no-op) ----
    hdn = jnp.dot(x1, wbig_ref[:, 0:HDN],
                  preferred_element_type=jnp.float32) + b1
    hdn = jnp.maximum(hdn, 0.0)
    ff = jnp.dot(hdn, w2_ref[...], preferred_element_type=jnp.float32) + b2

    # ---- residual + LayerNorm2 ----
    out_ref[...] = _layernorm(x1 + ff, g2, b2ln).astype(out_ref.dtype)


# ------------------------------ the wrapper ------------------------------- #
@jax.jit
def block_forward(x, params):
    B, T, E = x.shape
    bt = B * T
    H, NH, HDN = HEAD_SIZE, NUM_HEADS, HIDDEN
    x2d = x.reshape(bt, E).astype(jnp.float32)

    # Fold the output projection into the value weights per head:
    #   Wvp_h = Wv[:, h] @ Wproj[h]  (E, E)   -> attention becomes sum_h p_h @ (x @ Wvp_h)
    wvp = jnp.concatenate(
        [params["wv"][:, h * H:(h + 1) * H] @ params["wproj"][h * H:(h + 1) * H, :]
         for h in range(NH)], axis=1)                                   # (E, NH*E)

    # All K=E-contraction weights in one operand: [w1 | wq | wk | wvp] -> (E, 320)
    wbig = jnp.concatenate([params["w1"], params["wq"], params["wk"], wvp], axis=1)

    # Pack every small vector into a single (8, HIDDEN) operand.
    small = jnp.zeros((8, HDN), jnp.float32)
    small = small.at[0, :].set(params["b1"][0])
    small = small.at[1, 0 * E:1 * E].set(params["bproj"][0])
    small = small.at[1, 1 * E:2 * E].set(params["ln1_g"][0])
    small = small.at[1, 2 * E:3 * E].set(params["ln1_b"][0])
    small = small.at[1, 3 * E:4 * E].set(params["b2"][0])
    small = small.at[2, 0 * E:1 * E].set(params["ln2_g"][0])
    small = small.at[2, 1 * E:2 * E].set(params["ln2_b"][0])

    cost = pl.CostEstimate(
        flops=(2 * bt * E * (2 * E + NH * E)                 # fused QKV'
               + NH * (2 * bt * bt * H + 2 * bt * bt * E)    # attention
               + 2 * bt * E * HDN + 2 * bt * HDN * E),       # FF
        transcendentals=NH * bt * bt + 2 * bt,               # exps + rsqrts
        bytes_accessed=4 * (bt * E                           # x
                            + E * (HDN + 2 * E + NH * E)     # wbig
                            + HDN * E                        # w2
                            + 8 * HDN                        # small
                            + bt * E),                       # out
    )

    out2d = pl.pallas_call(
        block_kernel,
        out_shape=jax.ShapeDtypeStruct((bt, E), jnp.float32),
        cost_estimate=cost,
        # Gridless single-TC call: total VMEM footprint < 100 KiB, one step,
        # no per-step pipeline overhead. Only 4 operand DMAs.
    )(x2d, wbig, params["w2"], small)
    return out2d.reshape(B, T, E)


# --------------------------- pure-JAX reference --------------------------- #
def block_reference(x, p):
    T, E, H, NH = BLOCK_SIZE, EMBED_SIZE, HEAD_SIZE, NUM_HEADS
    q = x @ p["wq"]
    k = x @ p["wk"]
    v = x @ p["wv"]
    causal = jnp.tril(jnp.ones((T, T), bool))
    outs = []
    for h in range(NH):
        qh, kh, vh = (a[..., h * H:(h + 1) * H] for a in (q, k, v))
        wei = jnp.einsum("btd,bsd->bts", qh, kh) * (H ** -0.5)
        wei = jnp.where(causal, wei, -jnp.inf)
        wei = jax.nn.softmax(wei, axis=-1)
        outs.append(jnp.einsum("bts,bsd->btd", wei, vh))
    att = jnp.concatenate(outs, axis=-1) @ p["wproj"] + p["bproj"]

    def ln(y, g, b):
        mu = y.mean(-1, keepdims=True)
        var = ((y - mu) ** 2).mean(-1, keepdims=True)
        return (y - mu) / jnp.sqrt(var + LN_EPS) * g + b

    x1 = ln(x + att, p["ln1_g"], p["ln1_b"])
    ff = jnp.maximum(x1 @ p["w1"] + p["b1"], 0.0) @ p["w2"] + p["b2"]
    return ln(x1 + ff, p["ln2_g"], p["ln2_b"])


# --------------------------------- main ----------------------------------- #
def make_params(key):
    ks = jax.random.split(key, 10)
    E, HDN = EMBED_SIZE, HIDDEN
    scale = 0.02
    return {
        "wq": jax.random.normal(ks[0], (E, E), jnp.float32) * scale,
        "wk": jax.random.normal(ks[1], (E, E), jnp.float32) * scale,
        "wv": jax.random.normal(ks[2], (E, E), jnp.float32) * scale,
        "wproj": jax.random.normal(ks[3], (E, E), jnp.float32) * scale,
        "bproj": jax.random.normal(ks[4], (1, E), jnp.float32) * scale,
        "ln1_g": jnp.ones((1, E), jnp.float32),
        "ln1_b": jnp.zeros((1, E), jnp.float32),
        "w1": jax.random.normal(ks[5], (E, HDN), jnp.float32) * scale,
        "b1": jax.random.normal(ks[6], (1, HDN), jnp.float32) * scale,
        "w2": jax.random.normal(ks[7], (HDN, E), jnp.float32) * scale,
        "b2": jax.random.normal(ks[8], (1, E), jnp.float32) * scale,
        "ln2_g": jnp.ones((1, E), jnp.float32),
        "ln2_b": jnp.zeros((1, E), jnp.float32),
    }


if __name__ == "__main__":
    key = jax.random.PRNGKey(0)
    kx, kp = jax.random.split(key)
    x = jax.random.normal(kx, (BATCH, BLOCK_SIZE, EMBED_SIZE), jnp.float32)
    params = make_params(kp)

    out = jax.block_until_ready(block_forward(x, params))
    ref = block_reference(x, params)

    assert out.shape == (BATCH, BLOCK_SIZE, EMBED_SIZE)
    assert jnp.allclose(out, ref, atol=2e-4, rtol=2e-4)

    print("KERNEL_OK")
</pallas_src>

<mosaic_0001>
module attributes {stable_mosaic.version = 11 : i64} {
  func.func @block_kernel(%arg0: memref<16x32xf32, #tpu.memory_space<vmem>>, %arg1: memref<32x320xf32, #tpu.memory_space<vmem>>, %arg2: memref<128x32xf32, #tpu.memory_space<vmem>>, %arg3: memref<8x128xf32, #tpu.memory_space<vmem>>, %arg4: memref<16x32xf32, #tpu.memory_space<vmem>>) attributes {dimension_semantics = [], scalar_prefetch = 0 : i64, scratch_operands = 0 : i64, tpu.core_type = #tpu.core_type<tc>} {
    %c0 = arith.constant 0 : index
    %c0_0 = arith.constant 0 : index
    %0 = vector.load %arg0[%c0, %c0_0] : memref<16x32xf32, #tpu.memory_space<vmem>>, vector<16x32xf32>
    %c0_1 = arith.constant 0 : index
    %c0_2 = arith.constant 0 : index
    %1 = vector.load %arg3[%c0_1, %c0_2] : memref<8x128xf32, #tpu.memory_space<vmem>>, vector<8x128xf32>
    %2 = vector.extract_strided_slice %1 {offsets = [0, 0], sizes = [1, 128], strides = [1, 1]} : vector<8x128xf32> to vector<1x128xf32>
    %3 = vector.extract_strided_slice %1 {offsets = [1, 0], sizes = [1, 32], strides = [1, 1]} : vector<8x128xf32> to vector<1x32xf32>
    %4 = vector.extract_strided_slice %1 {offsets = [1, 32], sizes = [1, 32], strides = [1, 1]} : vector<8x128xf32> to vector<1x32xf32>
    %5 = vector.extract_strided_slice %1 {offsets = [1, 64], sizes = [1, 32], strides = [1, 1]} : vector<8x128xf32> to vector<1x32xf32>
    %6 = vector.extract_strided_slice %1 {offsets = [1, 96], sizes = [1, 32], strides = [1, 1]} : vector<8x128xf32> to vector<1x32xf32>
    %7 = vector.extract_strided_slice %1 {offsets = [2, 0], sizes = [1, 32], strides = [1, 1]} : vector<8x128xf32> to vector<1x32xf32>
    %8 = vector.extract_strided_slice %1 {offsets = [2, 32], sizes = [1, 32], strides = [1, 1]} : vector<8x128xf32> to vector<1x32xf32>
    %9 = tpu.iota {dimensions = array<i32: 0>} : vector<16x16xi32>
    %10 = tpu.iota {dimensions = array<i32: 1>} : vector<16x16xi32>
    %c3_i32 = arith.constant 3 : i32
    %11 = vector.broadcast %c3_i32 : i32 to vector<16x16xi32>
    %12 = arith.shrsi %9, %11 : vector<16x16xi32>
    %c3_i32_3 = arith.constant 3 : i32
    %13 = vector.broadcast %c3_i32_3 : i32 to vector<16x16xi32>
    %14 = arith.shrsi %10, %13 : vector<16x16xi32>
    %15 = arith.cmpi eq, %12, %14 : vector<16x16xi32>
    %c7_i32 = arith.constant 7 : i32
    %16 = vector.broadcast %c7_i32 : i32 to vector<16x16xi32>
    %17 = arith.andi %10, %16 : vector<16x16xi32>
    %c7_i32_4 = arith.constant 7 : i32
    %18 = vector.broadcast %c7_i32_4 : i32 to vector<16x16xi32>
    %19 = arith.andi %9, %18 : vector<16x16xi32>
    %20 = arith.cmpi sle, %17, %19 : vector<16x16xi32>
    %21 = arith.andi %15, %20 : vector<16x16xi1>
    %cst = arith.constant 0.000000e+00 : f32
    %cst_5 = arith.constant -1.000000e+30 : f32
    %22 = vector.broadcast %cst : f32 to vector<16x16xf32>
    %23 = vector.broadcast %cst_5 : f32 to vector<16x16xf32>
    %24 = arith.select %21, %22, %23 : vector<16x16xi1>, vector<16x16xf32>
    %c0_6 = arith.constant 0 : index
    %c128 = arith.constant 128 : index
    %25 = vector.load %arg1[%c0_6, %c128] : memref<32x320xf32, #tpu.memory_space<vmem>>, vector<32x192xf32>
    %cst_7 = arith.constant dense<0.000000e+00> : vector<16x192xf32>
    %26 = tpu.matmul %0, %25, %cst_7 {dimension_numbers = #tpu.dot_dimension_numbers<[1], [0], [0], [1], [0, 0, 1, 1], [], []>} : vector<16x32xf32>, vector<32x192xf32>, vector<16x192xf32> -> vector<16x192xf32>
    %27 = vector.extract_strided_slice %26 {offsets = [0, 0], sizes = [16, 32], strides = [1, 1]} : vector<16x192xf32> to vector<16x32xf32>
    %cst_8 = arith.constant 0.353553385 : f32
    %28 = vector.broadcast %cst_8 : f32 to vector<16x32xf32>
    %29 = arith.mulf %27, %28 : vector<16x32xf32>
    %30 = vector.extract_strided_slice %26 {offsets = [0, 32], sizes = [16, 32], strides = [1, 1]} : vector<16x192xf32> to vector<16x32xf32>
    %31 = vector.extract_strided_slice %29 {offsets = [0, 0], sizes = [16, 8], strides = [1, 1]} : vector<16x32xf32> to vector<16x8xf32>
    %32 = vector.extract_strided_slice %30 {offsets = [0, 0], sizes = [16, 8], strides = [1, 1]} : vector<16x32xf32> to vector<16x8xf32>
    %cst_9 = arith.constant dense<0.000000e+00> : vector<16x16xf32>
    %33 = tpu.matmul %31, %32, %cst_9 {dimension_numbers = #tpu.dot_dimension_numbers<[1], [1], [0], [0], [0, 0, 1, 0], [], []>} : vector<16x8xf32>, vector<16x8xf32>, vector<16x16xf32> -> vector<16x16xf32>
    %34 = arith.addf %33, %24 : vector<16x16xf32>
    %cst_10 = arith.constant dense<0xFF800000> : vector<16xf32>
    %35 = vector.multi_reduction <maximumf>, %34, %cst_10 [1] : vector<16x16xf32> to vector<16xf32>
    %36 = vector.shape_cast %35 : vector<16xf32> to vector<16x1xf32>
    %37 = vector.broadcast %36 : vector<16x1xf32> to vector<16x16xf32>
    %38 = arith.subf %34, %37 : vector<16x16xf32>
    %39 = math.exp %38 : vector<16x16xf32>
    %cst_11 = arith.constant dense<0.000000e+00> : vector<16xf32>
    %40 = vector.multi_reduction <add>, %39, %cst_11 [1] : vector<16x16xf32> to vector<16xf32>
    %41 = vector.shape_cast %40 : vector<16xf32> to vector<16x1xf32>
    %42 = vector.broadcast %41 : vector<16x1xf32> to vector<16x16xf32>
    %43 = arith.divf %39, %42 : vector<16x16xf32>
    %44 = vector.extract_strided_slice %26 {offsets = [0, 64], sizes = [16, 32], strides = [1, 1]} : vector<16x192xf32> to vector<16x32xf32>
    %cst_12 = arith.constant dense<0.000000e+00> : vector<16x32xf32>
    %45 = tpu.matmul %43, %44, %cst_12 {dimension_numbers = #tpu.dot_dimension_numbers<[1], [0], [0], [1], [0, 0, 1, 1], [], []>} : vector<16x16xf32>, vector<16x32xf32>, vector<16x32xf32> -> vector<16x32xf32>
    %46 = vector.extract_strided_slice %29 {offsets = [0, 8], sizes = [16, 8], strides = [1, 1]} : vector<16x32xf32> to vector<16x8xf32>
    %47 = vector.extract_strided_slice %30 {offsets = [0, 8], sizes = [16, 8], strides = [1, 1]} : vector<16x32xf32> to vector<16x8xf32>
    %cst_13 = arith.constant dense<0.000000e+00> : vector<16x16xf32>
    %48 = tpu.matmul %46, %47, %cst_13 {dimension_numbers = #tpu.dot_dimension_numbers<[1], [1], [0], [0], [0, 0, 1, 0], [], []>} : vector<16x8xf32>, vector<16x8xf32>, vector<16x16xf32> -> vector<16x16xf32>
    %49 = arith.addf %48, %24 : vector<16x16xf32>
    %cst_14 = arith.constant dense<0xFF800000> : vector<16xf32>
    %50 = vector.multi_reduction <maximumf>, %49, %cst_14 [1] : vector<16x16xf32> to vector<16xf32>
    %51 = vector.shape_cast %50 : vector<16xf32> to vector<16x1xf32>
    %52 = vector.broadcast %51 : vector<16x1xf32> to vector<16x16xf32>
    %53 = arith.subf %49, %52 : vector<16x16xf32>
    %54 = math.exp %53 : vector<16x16xf32>
    %cst_15 = arith.constant dense<0.000000e+00> : vector<16xf32>
    %55 = vector.multi_reduction <add>, %54, %cst_15 [1] : vector<16x16xf32> to vector<16xf32>
    %56 = vector.shape_cast %55 : vector<16xf32> to vector<16x1xf32>
    %57 = vector.broadcast %56 : vector<16x1xf32> to vector<16x16xf32>
    %58 = arith.divf %54, %57 : vector<16x16xf32>
    %59 = vector.extract_strided_slice %26 {offsets = [0, 96], sizes = [16, 32], strides = [1, 1]} : vector<16x192xf32> to vector<16x32xf32>
    %cst_16 = arith.constant dense<0.000000e+00> : vector<16x32xf32>
    %60 = tpu.matmul %58, %59, %cst_16 {dimension_numbers = #tpu.dot_dimension_numbers<[1], [0], [0], [1], [0, 0, 1, 1], [], []>} : vector<16x16xf32>, vector<16x32xf32>, vector<16x32xf32> -> vector<16x32xf32>
    %61 = arith.addf %45, %60 : vector<16x32xf32>
    %62 = vector.extract_strided_slice %29 {offsets = [0, 16], sizes = [16, 8], strides = [1, 1]} : vector<16x32xf32> to vector<16x8xf32>
    %63 = vector.extract_strided_slice %30 {offsets = [0, 16], sizes = [16, 8], strides = [1, 1]} : vector<16x32xf32> to vector<16x8xf32>
    %cst_17 = arith.constant dense<0.000000e+00> : vector<16x16xf32>
    %64 = tpu.matmul %62, %63, %cst_17 {dimension_numbers = #tpu.dot_dimension_numbers<[1], [1], [0], [0], [0, 0, 1, 0], [], []>} : vector<16x8xf32>, vector<16x8xf32>, vector<16x16xf32> -> vector<16x16xf32>
    %65 = arith.addf %64, %24 : vector<16x16xf32>
    %cst_18 = arith.constant dense<0xFF800000> : vector<16xf32>
    %66 = vector.multi_reduction <maximumf>, %65, %cst_18 [1] : vector<16x16xf32> to vector<16xf32>
    %67 = vector.shape_cast %66 : vector<16xf32> to vector<16x1xf32>
    %68 = vector.broadcast %67 : vector<16x1xf32> to vector<16x16xf32>
    %69 = arith.subf %65, %68 : vector<16x16xf32>
    %70 = math.exp %69 : vector<16x16xf32>
    %cst_19 = arith.constant dense<0.000000e+00> : vector<16xf32>
    %71 = vector.multi_reduction <add>, %70, %cst_19 [1] : vector<16x16xf32> to vector<16xf32>
    %72 = vector.shape_cast %71 : vector<16xf32> to vector<16x1xf32>
    %73 = vector.broadcast %72 : vector<16x1xf32> to vector<16x16xf32>
    %74 = arith.divf %70, %73 : vector<16x16xf32>
    %75 = vector.extract_strided_slice %26 {offsets = [0, 128], sizes = [16, 32], strides = [1, 1]} : vector<16x192xf32> to vector<16x32xf32>
    %cst_20 = arith.constant dense<0.000000e+00> : vector<16x32xf32>
    %76 = tpu.matmul %74, %75, %cst_20 {dimension_numbers = #tpu.dot_dimension_numbers<[1], [0], [0], [1], [0, 0, 1, 1], [], []>} : vector<16x16xf32>, vector<16x32xf32>, vector<16x32xf32> -> vector<16x32xf32>
    %77 = arith.addf %61, %76 : vector<16x32xf32>
    %78 = vector.extract_strided_slice %29 {offsets = [0, 24], sizes = [16, 8], strides = [1, 1]} : vector<16x32xf32> to vector<16x8xf32>
    %79 = vector.extract_strided_slice %30 {offsets = [0, 24], sizes = [16, 8], strides = [1, 1]} : vector<16x32xf32> to vector<16x8xf32>
    %cst_21 = arith.constant dense<0.000000e+00> : vector<16x16xf32>
    %80 = tpu.matmul %78, %79, %cst_21 {dimension_numbers = #tpu.dot_dimension_numbers<[1], [1], [0], [0], [0, 0, 1, 0], [], []>} : vector<16x8xf32>, vector<16x8xf32>, vector<16x16xf32> -> vector<16x16xf32>
    %81 = arith.addf %80, %24 : vector<16x16xf32>
    %cst_22 = arith.constant dense<0xFF800000> : vector<16xf32>
    %82 = vector.multi_reduction <maximumf>, %81, %cst_22 [1] : vector<16x16xf32> to vector<16xf32>
    %83 = vector.shape_cast %82 : vector<16xf32> to vector<16x1xf32>
    %84 = vector.broadcast %83 : vector<16x1xf32> to vector<16x16xf32>
    %85 = arith.subf %81, %84 : vector<16x16xf32>
    %86 = math.exp %85 : vector<16x16xf32>
    %cst_23 = arith.constant dense<0.000000e+00> : vector<16xf32>
    %87 = vector.multi_reduction <add>, %86, %cst_23 [1] : vector<16x16xf32> to vector<16xf32>
    %88 = vector.shape_cast %87 : vector<16xf32> to vector<16x1xf32>
    %89 = vector.broadcast %88 : vector<16x1xf32> to vector<16x16xf32>
    %90 = arith.divf %86, %89 : vector<16x16xf32>
    %91 = vector.extract_strided_slice %26 {offsets = [0, 160], sizes = [16, 32], strides = [1, 1]} : vector<16x192xf32> to vector<16x32xf32>
    %cst_24 = arith.constant dense<0.000000e+00> : vector<16x32xf32>
    %92 = tpu.matmul %90, %91, %cst_24 {dimension_numbers = #tpu.dot_dimension_numbers<[1], [0], [0], [1], [0, 0, 1, 1], [], []>} : vector<16x16xf32>, vector<16x32xf32>, vector<16x32xf32> -> vector<16x32xf32>
    %93 = arith.addf %77, %92 : vector<16x32xf32>
    %94 = vector.broadcast %3 : vector<1x32xf32> to vector<16x32xf32>
    %95 = arith.addf %93, %94 : vector<16x32xf32>
    %96 = arith.addf %0, %95 : vector<16x32xf32>
    %cst_25 = arith.constant dense<0.000000e+00> : vector<16xf32>
    %97 = vector.multi_reduction <add>, %96, %cst_25 [1] : vector<16x32xf32> to vector<16xf32>
    %98 = vector.shape_cast %97 : vector<16xf32> to vector<16x1xf32>
    %cst_26 = arith.constant 3.200000e+01 : f32
    %99 = vector.broadcast %cst_26 : f32 to vector<16x1xf32>
    %100 = arith.divf %98, %99 : vector<16x1xf32>
    %101 = vector.broadcast %100 : vector<16x1xf32> to vector<16x32xf32>
    %102 = arith.subf %96, %101 : vector<16x32xf32>
    %103 = arith.mulf %102, %102 : vector<16x32xf32>
    %cst_27 = arith.constant dense<0.000000e+00> : vector<16xf32>
    %104 = vector.multi_reduction <add>, %103, %cst_27 [1] : vector<16x32xf32> to vector<16xf32>
    %105 = vector.shape_cast %104 : vector<16xf32> to vector<16x1xf32>
    %cst_28 = arith.constant 3.200000e+01 : f32
    %106 = vector.broadcast %cst_28 : f32 to vector<16x1xf32>
    %107 = arith.divf %105, %106 : vector<16x1xf32>
    %108 = vector.broadcast %100 : vector<16x1xf32> to vector<16x32xf32>
    %109 = arith.subf %96, %108 : vector<16x32xf32>
    %cst_29 = arith.constant 9.99999974E-6 : f32
    %110 = vector.broadcast %cst_29 : f32 to vector<16x1xf32>
    %111 = arith.addf %107, %110 : vector<16x1xf32>
    %112 = math.rsqrt %111 : vector<16x1xf32>
    %113 = vector.broadcast %112 : vector<16x1xf32> to vector<16x32xf32>
    %114 = arith.mulf %109, %113 : vector<16x32xf32>
    %115 = vector.broadcast %4 : vector<1x32xf32> to vector<16x32xf32>
    %116 = arith.mulf %114, %115 : vector<16x32xf32>
    %117 = vector.broadcast %5 : vector<1x32xf32> to vector<16x32xf32>
    %118 = arith.addf %116, %117 : vector<16x32xf32>
    %c0_30 = arith.constant 0 : index
    %c0_31 = arith.constant 0 : index
    %119 = vector.load %arg1[%c0_30, %c0_31] : memref<32x320xf32, #tpu.memory_space<vmem>>, vector<32x128xf32>
    %cst_32 = arith.constant dense<0.000000e+00> : vector<16x128xf32>
    %120 = tpu.matmul %118, %119, %cst_32 {dimension_numbers = #tpu.dot_dimension_numbers<[1], [0], [0], [1], [0, 0, 1, 1], [], []>} : vector<16x32xf32>, vector<32x128xf32>, vector<16x128xf32> -> vector<16x128xf32>
    %121 = vector.broadcast %2 : vector<1x128xf32> to vector<16x128xf32>
    %122 = arith.addf %120, %121 : vector<16x128xf32>
    %cst_33 = arith.constant 0.000000e+00 : f32
    %123 = vector.broadcast %cst_33 : f32 to vector<16x128xf32>
    %124 = arith.maximumf %122, %123 : vector<16x128xf32>
    %c0_34 = arith.constant 0 : index
    %c0_35 = arith.constant 0 : index
    %125 = vector.load %arg2[%c0_34, %c0_35] : memref<128x32xf32, #tpu.memory_space<vmem>>, vector<128x32xf32>
    %cst_36 = arith.constant dense<0.000000e+00> : vector<16x32xf32>
    %126 = tpu.matmul %124, %125, %cst_36 {dimension_numbers = #tpu.dot_dimension_numbers<[1], [0], [0], [1], [0, 0, 1, 1], [], []>} : vector<16x128xf32>, vector<128x32xf32>, vector<16x32xf32> -> vector<16x32xf32>
    %127 = vector.broadcast %6 : vector<1x32xf32> to vector<16x32xf32>
    %128 = arith.addf %126, %127 : vector<16x32xf32>
    %129 = arith.addf %118, %128 : vector<16x32xf32>
    %cst_37 = arith.constant dense<0.000000e+00> : vector<16xf32>
    %130 = vector.multi_reduction <add>, %129, %cst_37 [1] : vector<16x32xf32> to vector<16xf32>
    %131 = vector.shape_cast %130 : vector<16xf32> to vector<16x1xf32>
    %cst_38 = arith.constant 3.200000e+01 : f32
    %132 = vector.broadcast %cst_38 : f32 to vector<16x1xf32>
    %133 = arith.divf %131, %132 : vector<16x1xf32>
    %134 = vector.broadcast %133 : vector<16x1xf32> to vector<16x32xf32>
    %135 = arith.subf %129, %134 : vector<16x32xf32>
    %136 = arith.mulf %135, %135 : vector<16x32xf32>
    %cst_39 = arith.constant dense<0.000000e+00> : vector<16xf32>
    %137 = vector.multi_reduction <add>, %136, %cst_39 [1] : vector<16x32xf32> to vector<16xf32>
    %138 = vector.shape_cast %137 : vector<16xf32> to vector<16x1xf32>
    %cst_40 = arith.constant 3.200000e+01 : f32
    %139 = vector.broadcast %cst_40 : f32 to vector<16x1xf32>
    %140 = arith.divf %138, %139 : vector<16x1xf32>
    %141 = vector.broadcast %133 : vector<16x1xf32> to vector<16x32xf32>
    %142 = arith.subf %129, %141 : vector<16x32xf32>
    %cst_41 = arith.constant 9.99999974E-6 : f32
    %143 = vector.broadcast %cst_41 : f32 to vector<16x1xf32>
    %144 = arith.addf %140, %143 : vector<16x1xf32>
    %145 = math.rsqrt %144 : vector<16x1xf32>
    %146 = vector.broadcast %145 : vector<16x1xf32> to vector<16x32xf32>
    %147 = arith.mulf %142, %146 : vector<16x32xf32>
    %148 = vector.broadcast %7 : vector<1x32xf32> to vector<16x32xf32>
    %149 = arith.mulf %147, %148 : vector<16x32xf32>
    %150 = vector.broadcast %8 : vector<1x32xf32> to vector<16x32xf32>
    %151 = arith.addf %149, %150 : vector<16x32xf32>
    %c0_42 = arith.constant 0 : index
    %c0_43 = arith.constant 0 : index
    %152 = vector.load %arg4[%c0_42, %c0_43] : memref<16x32xf32, #tpu.memory_space<vmem>>, vector<16x32xf32>
    tpu.vector_store %arg4[%c0_42, %c0_43], %151 {strides = array<i32>} : memref<16x32xf32, #tpu.memory_space<vmem>>, vector<16x32xf32>,
    return
  }
}

</mosaic_0001>

<bundles_post_ra>
// kernel: block_forward.1
= control target key start
LH: loop header
LB: loop body
LE: loop exit
PB: predicated region body
PF: predicated region fallthrough
CT: control target
= control target key end

     0   :  { %s1287_s0 = inlined_call_operand.vmem [shape: f32[16,32], index: 0, kind: input, shape index: {}]   ;;  %s1288_s1 = inlined_call_operand.vmem [shape: f32[32,320], index: 1, kind: input, shape index: {}]   ;;  %s1289_s2 = inlined_call_operand.vmem [shape: f32[128,32], index: 2, kind: input, shape index: {}]   ;;  %s1290_s3 = inlined_call_operand.vmem [shape: f32[8,128], index: 3, kind: input, shape index: {}]   ;;  %s1291_s4 = inlined_call_operand.hbm [shape: f32[16,32], index: 4, kind: output, shape index: {}]  }
   0x1   :  { %v46_v0 = vld [vmem:[%s1288_s1 + $0x50] sm:$0xff]  ;;  %v44_v1 = vld [vmem:[%s1288_s1 + $0x38] sm:$0xff]  ;;  %v42_v2 = vld [vmem:[%s1288_s1 + $0x20] sm:$0xff] }
   0x2   :  { %67 = vmatpush.msra.mxu0 %v46_v0 }
   0x3   :  { %9 = vsyncpa [#allocation3], 0  ;;  %v40_v3 = vld [vmem:[%s1288_s1 + $0x8] sm:$0xff]  ;;  %v996_v4 = vld [vmem:[%s1287_s0] sm:$0xff]  ;;  %vm48_vm0 = vcmask 261120   ;;  %s942_s27 = smov 96   ;;  %v21_v16 = vlaneseq }
   0x4   :  { %68 = vmatpush.msra.mxu0 %v44_v1  ;;  %v1003_v5 = vld [vmem:[%s1287_s0 + $0x8] sm:$0xff]  ;;  %s943_s28 = smov 120   ;;  %s944_s29 = smov 88   ;;  %vm109_vm1 = vcmask 64512   ;;  %v945_v26 = vmov -1e+30  }
   0x5   :  { %v22_v17 = vshrl.u32 %v21_v16, 7  ;;  %v25_v18 = vand.u32 127, %v21_v16  ;;  %vm143_vm7 = vcmask 130048   ;;  %s946_s0 = smov 80   ;;  %s947_s30 = smov 32  }
   0x6   :  { %69 = vmatpush.msra.mxu0 %v42_v2  ;;  %s948_s5 = smov 72   ;;  %s949_s6 = smov 104  }
   0x7   :  { %v26_v19 = vshra.s32 %v22_v17, 3  ;;  %v28_v20 = vshra.s32 %v25_v18, 3  ;;  %v31_v21 = vand.u32 7, %v25_v18  ;;  %v32_v22 = vand.u32 7, %v22_v17  ;;  %s950_s7 = smov 112   ;;  %s951_s16 = smov 64  }
   0x8   :  { %70 = vmatpush.msra.mxu0 %v40_v3  ;;  %v23_v23 = vadd.s32 8, %v22_v17 }
   0x9   :  { %813 = vmatmul.msk.f32.vlgmr.msra.gmra.mxu0 %vm48_vm0, %v996_v4  ;;  %vm29_vm2 = vcmp.eq.s32.totalorder %v26_v19, %v28_v20  ;;  %vm34_vm3 = vcmp.le.s32.totalorder %v31_v21, %v32_v22 }
   0xa   :  { %v27_v24 = vshra.s32 %v23_v23, 3  ;;  %v33_v25 = vand.u32 7, %v23_v23  ;;  %vm36_vm4 = vmand %vm29_vm2, %vm34_vm3 }
   0xb   :  { %v1032_v27 = vsel %vm36_vm4, 0.0, %v945_v26 }
   0xc   :  { %vm30_vm5 = vcmp.eq.s32.totalorder %v27_v24, %v28_v20  ;;  %vm35_vm6 = vcmp.le.s32.totalorder %v31_v21, %v33_v25  ;;  %v47_v25 = vld [vmem:[%s1288_s1 + $0x58] sm:$0xff] }
   0xd   :  { %vm37_vm8 = vmand %vm30_vm5, %vm35_vm6  ;;  %90 = vmatpush.msra.mxu1 %v47_v25 }
   0xe   :  { %v1036_v31 = vsel %vm37_vm8, 0.0, %v945_v26  ;;  %v45_v26 = vld [vmem:[%s1288_s1 + $0x40] sm:$0xff] }
   0xf   :  { %91 = vmatpush.msra.mxu1 %v45_v26 }
  0x11   :  { %814 = vmatmul.msk.f32.gmra.mxu0 %vm48_vm0, %v1003_v5 }
  0x86   :  { %v1007_v6 = vpop.f32.mrf.mxu0 }
  0x87   :  { %105 = vrot.lane.b32.xlu2 %v1007_v6, %s942_s27  ;;  %v1012_v7 = vmul.f32 0.35355338, %v1007_v6 }
  0x89   :  { %192 = vrot.lane.b32.xlu1 %v1012_v7, %s943_s28 }
  0x8e   :  { %v75_v8 = vpop.f32.mrf.mxu0 }
  0x8f   :  { %198 = vrot.lane.b32.xlu0 %v75_v8, %s944_s29  ;;  %v1015_v9 = vmul.f32 0.35355338, %v75_v8  ;;  %v1041_v35 = vpack.i.bf16 %v1007_v6, %v75_v8 }
  0x91   :  { %194 = vrot.lane.b32.xlu1 %v1015_v9, %s943_s28 }
  0x97   :  { %196 = vrot.lane.b32.xlu0 %v1007_v6, %s944_s29 }
  0x9f   :  { %107 = vrot.lane.b32.xlu0 %v75_v8, %s942_s27 }
  0xe1   :  { %v106_v15 = vpop.permute.xlu2 %105 }
  0xfb   :  { %v193_v11 = vpop.permute.xlu1 %192 }
 0x101   :  { %v199_v10 = vpop.permute.xlu0 %198 }
 0x102   :  { %821 = vmatpush.xpose.msk.msrb.mxu0 %vm109_vm1, %v199_v10  ;;  %843 = vmatpush.xpose.msk.msra.mxu3 %vm109_vm1, %v199_v10 }
 0x103   :  { %v195_v13 = vpop.permute.xlu1 %194 }
 0x109   :  { %v197_v12 = vpop.permute.xlu0 %196 }
 0x10a   :  { %822 = vmatpush.xpose.msk.msrb.mxu0 %vm109_vm1, %v197_v12  ;;  %844 = vmatpush.xpose.msk.msra.mxu3 %vm109_vm1, %v197_v12 }
 0x10d   :  { %823 = vmatmul.msk.f32.vlgmr.msrb.gmra.mxu0 %vm109_vm1, %v193_v11  ;;  %824 = vmatmul.msk.f32.vlgmr.msra.gmra.mxu3 %vm109_vm1, %v195_v13 }
 0x111   :  { %v108_v14 = vpop.permute.xlu0 %107 }
 0x112   :  { %817 = vmatpush.xpose.msk.msra.mxu2 %vm109_vm1, %v108_v14 }
 0x116   :  { %818 = vmatpush.xpose.msk.msra.mxu2 %vm109_vm1, %v106_v15 }
 0x119   :  { %819 = vmatmul.msk.f32.vlgmr.msra.gmra.mxu2 %vm109_vm1, %v1012_v7 }
 0x121   :  { %820 = vmatmul.msk.f32.gmra.mxu2 %vm109_vm1, %v1015_v9 }
 0x18a   :  { %v225_v28 = vpop.f32.mrf.mxu0 }
 0x18b   :  { %v226_v29 = vadd.f32 %v225_v28, %v1032_v27 }
 0x18d   :  { %v231_v30 = vsel %vm143_vm7, %v226_v29, -inf }
 0x18e   :  { %232 = vmax.xlane.f32.xlu2 %v231_v30  ;;  %v41_v30 = vld [vmem:[%s1288_s1 + $0x10] sm:$0xff] }
 0x190   :  { %v228_v32 = vpop.f32.mrf.mxu3 }
 0x191   :  { %v229_v33 = vadd.f32 %v228_v32, %v1036_v31 }
 0x193   :  { %v234_v34 = vsel %vm143_vm7, %v229_v33, -inf }
 0x196   :  { %235 = vmax.xlane.f32.xlu2 %v234_v34 }
 0x19c   :  { %v137_v36 = vpop.f32.mrf.mxu2 }
 0x19d   :  { %v1065_v57 = vadd.f32 %v137_v36, %v1032_v27 }
 0x19f   :  { %v144_v58 = vsel %vm143_vm7, %v1065_v57, -inf }
 0x1a4   :  { %v140_v37 = vpop.f32.mrf.mxu2 }
 0x1a5   :  { %v1050_v38 = vadd.f32 %v140_v37, %v1036_v31 }
 0x1a7   :  { %v147_v39 = vsel %vm143_vm7, %v1050_v38, -inf }
 0x1ae   :  { %355 = vrot.lane.b32.xlu2 %v75_v8, %s946_s0 }
 0x1b6   :  { %860 = vrot.lane.b32.xlu2 %v1041_v35, %s947_s30 }
 0x1be   :  { %353 = vrot.lane.b32.xlu2 %v1007_v6, %s946_s0 }
 0x1c6   :  { %473 = vrot.lane.b32.xlu2 %v75_v8, %s948_s5 }
 0x1ce   :  { %471 = vrot.lane.b32.xlu2 %v1007_v6, %s948_s5 }
 0x1d6   :  { %467 = vrot.lane.b32.xlu2 %v1012_v7, %s949_s6 }
 0x1ff   :  { %148 = vmax.xlane.f32.xlu2 %v147_v39 }
 0x201   :  { %v233_v40 = vpop.xlane.xlu2 %232 }
 0x202   :  { %v237_v41 = vsub.f32 %v226_v29, %v233_v40  ;;  %v43_v29 = vld [vmem:[%s1288_s1 + $0x28] sm:$0xff] }
 0x203   :  { %92 = vmatpush.msra.mxu1 %v43_v29 }
 0x204   :  { %v239_v42 = vmul.f32 1.442695, %v237_v41 }
 0x205   :  { %93 = vmatpush.msra.mxu1 %v41_v30 }
 0x206   :  { %874 = vpow2.f32 %v239_v42  ;;  %815 = vmatmul.msk.f32.vlgmr.msra.gmra.mxu1 %vm48_vm0, %v996_v4 }
 0x209   :  { %v236_v43 = vpop.xlane.xlu2 %235 }
 0x20a   :  { %v238_v44 = vsub.f32 %v229_v33, %v236_v43 }
 0x20c   :  { %v875_v45 = vpop.eup %874  ;;  %v241_v46 = vmul.f32 1.442695, %v238_v44 }
 0x20d   :  { %v243_v47 = vsel %vm143_vm7, %v875_v45, 0.0 }
 0x20e   :  { %876 = vpow2.f32 %v241_v46  ;;  %244 = vadd.xlane.f32.xlu1 %v243_v47  ;;  %816 = vmatmul.msk.f32.gmra.mxu1 %vm48_vm0, %v1003_v5 }
 0x211   :  { %v356_v48 = vpop.permute.xlu2 %355 }
 0x212   :  { %829 = vmatpush.xpose.msk.msrb.mxu2 %vm109_vm1, %v356_v48 }
 0x214   :  { %v877_v49 = vpop.eup %876 }
 0x215   :  { %v246_v50 = vsel %vm143_vm7, %v877_v49, 0.0 }
 0x216   :  { %247 = vadd.xlane.f32.xlu0 %v246_v50 }
 0x219   :  { %v861_v51 = vpop.permute.xlu2 %860 }
 0x21a   :  { %v862_v52 = vunpack.i.l.bf16 %v861_v51  ;;  %v863_v53 = vunpack.i.h.bf16 %v861_v51 }
 0x21c   :  { %305 = vmatpush.msra.mxu0 %v862_v52 }
 0x21e   :  { %306 = vmatpush.msra.mxu0 %v863_v53 }
 0x221   :  { %v354_v54 = vpop.permute.xlu2 %353 }
 0x222   :  { %830 = vmatpush.xpose.msk.msrb.mxu2 %vm109_vm1, %v354_v54 }
 0x227   :  { %349 = vrot.lane.b32.xlu1 %v1012_v7, %s950_s7 }
 0x229   :  { %v474_v55 = vpop.permute.xlu2 %473 }
 0x22a   :  { %351 = vrot.lane.b32.xlu0 %v1015_v9, %s950_s7  ;;  %835 = vmatpush.xpose.msk.msrb.mxu0 %vm109_vm1, %v474_v55  ;;  %s955_s7 = smov 8  }
 0x22f   :  { %469 = vrot.lane.b32.xlu1 %v1015_v9, %s949_s6  ;;  %s954_s6 = smov 128  }
 0x231   :  { %v472_v56 = vpop.permute.xlu2 %471 }
 0x232   :  { %836 = vmatpush.xpose.msk.msrb.mxu0 %vm109_vm1, %v472_v56 }
 0x239   :  { %v468_v23 = vpop.permute.xlu2 %467 }
 0x254   :  { %145 = vmax.xlane.f32.xlu0 %v144_v58 }
 0x272   :  { %v149_v32 = vpop.xlane.xlu2 %148 }
 0x273   :  { %v151_v34 = vsub.f32 %v1050_v38, %v149_v32 }
 0x275   :  { %v154_v41 = vmul.f32 1.442695, %v151_v34 }
 0x281   :  { %v245_v59 = vpop.xlane.xlu1 %244 }
 0x282   :  { %878 = vrcp.f32 %v245_v59  ;;  %v260_v0 = vand.u32 2147483648, %v245_v59  ;;  %v258_v2 = vand.u32 2147483647, %v245_v59  ;;  %vm254_vm10 = vweird.f32 %v245_v59 }
 0x284   :  { %v261_v7 = vor.u32 1.1754944e-38, %v260_v0  ;;  %vm259_vm12 = vcmp.eq.f32.partialorder %v258_v2, 8.507059e+37 }
 0x288   :  { %v879_v60 = vpop.eup %878 }
 0x289   :  { %v250_v61 = vmul.f32 %v879_v60, %v245_v59  ;;  %v248_v62 = vpop.xlane.xlu0 %247  ;;  %vm255_vm9 = vweird.f32 %v879_v60 }
 0x28a   :  { %880 = vrcp.f32 %v248_v62  ;;  %vm256_vm11 = vmor %vm254_vm10, %vm255_vm9  ;;  %v275_v13 = vand.u32 2147483648, %v248_v62  ;;  %v273_v15 = vand.u32 2147483647, %v248_v62  ;;  %vm269_vm14 = vweird.f32 %v248_v62 }
 0x28b   :  { %v251_v63 = vsub.f32 1.0, %v250_v61  ;;  %882 = vpow2.f32 %v154_v41 }
 0x28c   :  { %v276_v17 = vor.u32 1.1754944e-38, %v275_v13  ;;  %vm274_vm2 = vcmp.eq.f32.partialorder %v273_v15, 8.507059e+37 }
 0x28d   :  { %v252_v1 = vmul.f32 %v879_v60, %v251_v63 }
 0x28f   :  { %v253_v3 = vadd.f32 %v879_v60, %v252_v1 }
 0x290   :  { %v881_v6 = vpop.eup %880 }
 0x291   :  { %v257_v8 = vsel %vm256_vm11, %v879_v60, %v253_v3  ;;  %v265_v9 = vmul.f32 %v881_v6, %v248_v62  ;;  %vm270_vm13 = vweird.f32 %v881_v6 }
 0x292   :  { %v262_v10 = vsel %vm259_vm12, %v261_v7, %v257_v8  ;;  %vm271_vm15 = vmor %vm269_vm14, %vm270_vm13 }
 0x293   :  { %v266_v11 = vsub.f32 1.0, %v265_v9  ;;  %v263_v12 = vmul.f32 %v875_v45, %v262_v10 }
 0x295   :  { %v267_v14 = vmul.f32 %v881_v6, %v266_v11  ;;  %825 = vmatmul.msk.f32.vlgmr.msra.gmra.mxu0 %vm143_vm7, %v263_v12 }
 0x297   :  { %v268_v16 = vadd.f32 %v881_v6, %v267_v14 }
 0x299   :  { %v350_v18 = vpop.permute.xlu1 %349  ;;  %v272_v19 = vsel %vm271_vm15, %v881_v6, %v268_v16 }
 0x29a   :  { %831 = vmatmul.msk.f32.vlgmr.msrb.gmra.mxu2 %vm109_vm1, %v350_v18  ;;  %v277_v20 = vsel %vm274_vm2, %v276_v17, %v272_v19 }
 0x29b   :  { %v278_v21 = vmul.f32 %v877_v49, %v277_v20  ;;  %v1103_v49 = vpop.eup %882 }
 0x29c   :  { %v352_v22 = vpop.permute.xlu0 %351  ;;  %v159_v53 = vsel %vm143_vm7, %v1103_v49, 0.0 }
 0x29d   :  { %826 = vmatmul.msk.f32.gmra.mxu0 %vm143_vm7, %v278_v21 }
 0x2a1   :  { %v470_v24 = vpop.permute.xlu1 %469 }
 0x2a2   :  { %832 = vmatmul.msk.f32.gmra.mxu2 %vm109_vm1, %v352_v22 }
 0x2a5   :  { %837 = vmatmul.msk.f32.vlgmr.msrb.gmra.mxu0 %vm109_vm1, %v468_v23 }
 0x2ad   :  { %838 = vmatmul.msk.f32.gmra.mxu0 %vm109_vm1, %v470_v24 }
 0x2c7   :  { %v146_v36 = vpop.xlane.xlu0 %145 }
 0x2c8   :  { %v150_v40 = vsub.f32 %v1065_v57, %v146_v36 }
 0x2ca   :  { %v152_v44 = vmul.f32 1.442695, %v150_v40 }
 0x2cc   :  { %884 = vpow2.f32 %v152_v44 }
 0x2d2   :  { %v1106_v52 = vpop.eup %884 }
 0x2d3   :  { %v156_v54 = vsel %vm143_vm7, %v1106_v52, 0.0 }
 0x312   :  { %v1081_v28 = vpop.f32.mrf.mxu0 }
 0x31a   :  { %v1091_v33 = vpop.f32.mrf.mxu0 }
 0x31d   :  { %v382_v37 = vpop.f32.mrf.mxu2 }
 0x31e   :  { %v383_v39 = vadd.f32 %v382_v37, %v1032_v27 }
 0x320   :  { %v388_v42 = vsel %vm143_vm7, %v383_v39, -inf }
 0x321   :  { %389 = vmax.xlane.f32.xlu1 %v388_v42 }
 0x322   :  { %v500_v43 = vpop.f32.mrf.mxu0 }
 0x323   :  { %v501_v45 = vadd.f32 %v500_v43, %v1032_v27 }
 0x325   :  { %v385_v46 = vpop.f32.mrf.mxu2  ;;  %v506_v38 = vsel %vm143_vm7, %v501_v45, -inf }
 0x326   :  { %v386_v47 = vadd.f32 %v385_v46, %v1036_v31  ;;  %507 = vmax.xlane.f32.xlu2 %v506_v38 }
 0x328   :  { %v391_v48 = vsel %vm143_vm7, %v386_v47, -inf }
 0x329   :  { %392 = vmax.xlane.f32.xlu0 %v391_v48 }
 0x32a   :  { %v503_v50 = vpop.f32.mrf.mxu0 }
 0x32b   :  { %v504_v51 = vadd.f32 %v503_v50, %v1036_v31  ;;  %v95_v31 = vpop.f32.mrf.mxu1 }
 0x32d   :  { %v509_v27 = vsel %vm143_vm7, %v504_v51, -inf }
 0x32e   :  { %510 = vmax.xlane.f32.xlu1 %v509_v27  ;;  %160 = vadd.xlane.f32.xlu2 %v159_v53 }
 0x331   :  { %157 = vadd.xlane.f32.xlu0 %v156_v54 }
 0x333   :  { %v98_v6 = vpop.f32.mrf.mxu1 }
 0x334   :  { %456 = vmatpush.msrb.mxu3 %v98_v6  ;;  %v869_v14 = vpack.i.bf16 %v95_v31, %v98_v6 }
 0x336   :  { %457 = vmatpush.msrb.mxu3 %v95_v31 }
 0x394   :  { %v390_v55 = vpop.xlane.xlu1 %389 }
 0x395   :  { %v394_v56 = vsub.f32 %v383_v39, %v390_v55 }
 0x397   :  { %v396_v57 = vmul.f32 1.442695, %v394_v56 }
 0x399   :  { %886 = vpow2.f32 %v396_v57  ;;  %v508_v58 = vpop.xlane.xlu2 %507 }
 0x39a   :  { %v512_v59 = vsub.f32 %v501_v45, %v508_v58 }
 0x39c   :  { %v514_v60 = vmul.f32 1.442695, %v512_v59  ;;  %v393_v61 = vpop.xlane.xlu0 %392 }
 0x39d   :  { %v395_v62 = vsub.f32 %v386_v47, %v393_v61 }
 0x39e   :  { %888 = vpow2.f32 %v514_v60 }
 0x39f   :  { %v887_v63 = vpop.eup %886  ;;  %v398_v0 = vmul.f32 1.442695, %v395_v62 }
 0x3a0   :  { %v400_v1 = vsel %vm143_vm7, %v887_v63, 0.0 }
 0x3a1   :  { %890 = vpow2.f32 %v398_v0  ;;  %401 = vadd.xlane.f32.xlu1 %v400_v1  ;;  %v511_v2 = vpop.xlane.xlu1 %510  ;;  %v1129_v17 = vpop.xlane.xlu2 %160 }
 0x3a2   :  { %v513_v3 = vsub.f32 %v504_v51, %v511_v2  ;;  %vm182_vm2 = vweird.f32 %v1129_v17 }
 0x3a4   :  { %v1114_v7 = vpop.eup %888  ;;  %v516_v8 = vmul.f32 1.442695, %v513_v3  ;;  %v158_v15 = vpop.xlane.xlu0 %157 }
 0x3a5   :  { %v518_v9 = vsel %vm143_vm7, %v1114_v7, 0.0  ;;  %vm167_vm8 = vweird.f32 %v158_v15  ;;  %v173_v48 = vand.u32 2147483648, %v158_v15  ;;  %v171_v51 = vand.u32 2147483647, %v158_v15 }
 0x3a6   :  { %892 = vpow2.f32 %v516_v8  ;;  %519 = vadd.xlane.f32.xlu2 %v518_v9  ;;  %v188_v9 = vand.u32 2147483648, %v1129_v17 }
 0x3a7   :  { %v1118_v10 = vpop.eup %890  ;;  %894 = vrcp.f32 %v158_v15  ;;  %v174_v59 = vor.u32 1.1754944e-38, %v173_v48  ;;  %vm172_vm13 = vcmp.eq.f32.partialorder %v171_v51, 8.507059e+37 }
 0x3a8   :  { %v403_v11 = vsel %vm143_vm7, %v1118_v10, 0.0 }
 0x3a9   :  { %404 = vadd.xlane.f32.xlu0 %v403_v11 }
 0x3ac   :  { %v1122_v12 = vpop.eup %892 }
 0x3ad   :  { %v521_v13 = vsel %vm143_vm7, %v1122_v12, 0.0  ;;  %v895_v18 = vpop.eup %894 }
 0x3ae   :  { %v163_v19 = vmul.f32 %v895_v18, %v158_v15  ;;  %vm168_vm6 = vweird.f32 %v895_v18  ;;  %v186_v15 = vand.u32 2147483647, %v1129_v17 }
 0x3af   :  { %vm1145_vm10 = vmor %vm167_vm8, %vm168_vm6 }
 0x3b1   :  { %522 = vadd.xlane.f32.xlu0 %v521_v13 }
 0x3ba   :  { %865 = vrot.lane.b32.xlu1 %v1041_v35, %s951_s16  ;;  %v164_v35 = vsub.f32 1.0, %v163_v19 }
 0x3bc   :  { %v165_v34 = vmul.f32 %v895_v18, %v164_v35 }
 0x3be   :  { %870 = vrot.lane.b32.xlu2 %v869_v14, %s942_s27  ;;  %v166_v44 = vadd.f32 %v895_v18, %v165_v34 }
 0x3c0   :  { %v170_v58 = vsel %vm1145_vm10, %v895_v18, %v166_v44 }
 0x3c1   :  { %v175_v1 = vsel %vm172_vm13, %v174_v59, %v170_v58  ;;  %v952_v58 = vmov 32.0  }
 0x3c2   :  { %v176_v14 = vmul.f32 %v1106_v52, %v175_v1 }
 0x414   :  { %v402_v16 = vpop.xlane.xlu1 %401 }
 0x415   :  { %896 = vrcp.f32 %v402_v16  ;;  %v417_v26 = vand.u32 2147483648, %v402_v16  ;;  %v415_v30 = vand.u32 2147483647, %v402_v16  ;;  %vm411_vm3 = vweird.f32 %v402_v16 }
 0x416   :  { %898 = vrcp.f32 %v1129_v17 }
 0x417   :  { %v418_v39 = vor.u32 1.1754944e-38, %v417_v26  ;;  %vm416_vm5 = vcmp.eq.f32.partialorder %v415_v30, 8.507059e+37 }
 0x419   :  { %v1134_v25 = vpop.xlane.xlu2 %519 }
 0x41a   :  { %v533_v35 = vand.u32 2147483647, %v1134_v25 }
 0x41b   :  { %v897_v20 = vpop.eup %896 }
 0x41c   :  { %v407_v21 = vmul.f32 %v897_v20, %v402_v16  ;;  %v405_v22 = vpop.xlane.xlu0 %404  ;;  %v1132_v23 = vpop.eup %898  ;;  %vm412_vm1 = vweird.f32 %v897_v20  ;;  %vm534_vm8 = vcmp.eq.f32.partialorder %v533_v35, 8.507059e+37 }
 0x41d   :  { %900 = vrcp.f32 %v405_v22  ;;  %v178_v32 = vmul.f32 %v1132_v23, %v1129_v17  ;;  %vm413_vm4 = vmor %vm411_vm3, %vm412_vm1  ;;  %v432_v50 = vand.u32 2147483648, %v405_v22  ;;  %v430_v53 = vand.u32 2147483647, %v405_v22 }
 0x41e   :  { %v408_v24 = vsub.f32 1.0, %v407_v21  ;;  %902 = vrcp.f32 %v1134_v25  ;;  %vm426_vm11 = vweird.f32 %v405_v22  ;;  %vm183_vm15 = vweird.f32 %v1132_v23 }
 0x41f   :  { %v179_v42 = vsub.f32 1.0, %v178_v32  ;;  %v433_v31 = vor.u32 1.1754944e-38, %v432_v50  ;;  %vm431_vm14 = vcmp.eq.f32.partialorder %v430_v53, 8.507059e+37  ;;  %vm184_vm1 = vmor %vm182_vm2, %vm183_vm15  ;;  %vm187_vm3 = vcmp.eq.f32.partialorder %v186_v15, 8.507059e+37  ;;  %v660_v15 = vld [vmem:[%s1288_s1] sm:$0xff] }
 0x420   :  { %v409_v29 = vmul.f32 %v897_v20, %v408_v24 }
 0x421   :  { %v180_v54 = vmul.f32 %v1132_v23, %v179_v42  ;;  %v871_v62 = vpop.permute.xlu2 %870 }
 0x422   :  { %v410_v36 = vadd.f32 %v897_v20, %v409_v29  ;;  %v872_v13 = vunpack.i.l.bf16 %v871_v62 }
 0x423   :  { %v901_v37 = vpop.eup %900  ;;  %v181_v6 = vadd.f32 %v1132_v23, %v180_v54 }
 0x424   :  { %v422_v40 = vmul.f32 %v901_v37, %v405_v22  ;;  %v414_v41 = vsel %vm413_vm4, %v897_v20, %v410_v36  ;;  %v1139_v46 = vpop.xlane.xlu0 %522  ;;  %v1141_v47 = vpop.eup %902  ;;  %vm427_vm9 = vweird.f32 %v901_v37  ;;  %v189_v20 = vor.u32 1.1754944e-38, %v188_v9 }
 0x425   :  { %v419_v43 = vsel %vm416_vm5, %v418_v39, %v414_v41  ;;  %904 = vrcp.f32 %v1139_v46  ;;  %v525_v56 = vmul.f32 %v1141_v47, %v1134_v25  ;;  %vm428_vm12 = vmor %vm426_vm11, %vm427_vm9  ;;  %v185_v19 = vsel %vm184_vm1, %v1132_v23, %v181_v6  ;;  %v1184_v41 = vld [vmem:[%s1290_s3] sm:$0xff] }
 0x426   :  { %v423_v45 = vsub.f32 1.0, %v422_v40  ;;  %v420_v38 = vmul.f32 %v887_v63, %v419_v43  ;;  %v190_v21 = vsel %vm187_vm3, %v189_v20, %v185_v19  ;;  %vm530_vm4 = vweird.f32 %v1141_v47  ;;  %v711_v19 = vld [vmem:[%s1289_s2 + $0x78] sm:$0xff]  ;;  %v710_v20 = vld [vmem:[%s1289_s2 + $0x70] sm:$0xff] }
 0x427   :  { %v526_v2 = vsub.f32 1.0, %v525_v56  ;;  %v535_v22 = vand.u32 2147483648, %v1134_v25  ;;  %vm529_vm5 = vweird.f32 %v1134_v25  ;;  %v191_v24 = vmul.f32 %v1103_v49, %v190_v21  ;;  %715 = vmatpush.msra.mxu3 %v711_v19 }
 0x428   :  { %v424_v27 = vmul.f32 %v901_v37, %v423_v45  ;;  %833 = vmatmul.msk.f32.vlgmr.msrb.gmra.mxu3 %vm143_vm7, %v420_v38  ;;  %vm531_vm6 = vmor %vm529_vm5, %vm530_vm4  ;;  %v550_v34 = vand.u32 2147483648, %v1139_v46  ;;  %vm544_vm10 = vweird.f32 %v1139_v46  ;;  %v548_v25 = vand.u32 2147483647, %v1139_v46 }
 0x429   :  { %v527_v16 = vmul.f32 %v1141_v47, %v526_v2  ;;  %v536_v29 = vor.u32 1.1754944e-38, %v535_v22  ;;  %906 = vrcp.f32 %v952_v58  ;;  %716 = vmatpush.msra.mxu3 %v710_v20  ;;  %v708_v22 = vld [vmem:[%s1289_s2 + $0x60] sm:$0xff]  ;;  %v697_v58 = vld [vmem:[%s1289_s2 + $0x8] sm:$0xff] }
 0x42a   :  { %v425_v57 = vadd.f32 %v901_v37, %v424_v27 }
 0x42b   :  { %v905_v8 = vpop.eup %904  ;;  %v528_v52 = vadd.f32 %v1141_v47, %v527_v16 }
 0x42c   :  { %v866_v60 = vpop.permute.xlu1 %865  ;;  %v429_v61 = vsel %vm428_vm12, %v901_v37, %v425_v57  ;;  %v540_v18 = vmul.f32 %v905_v8, %v1139_v46  ;;  %vm545_vm9 = vweird.f32 %v905_v8  ;;  %v551_v37 = vor.u32 1.1754944e-38, %v550_v34  ;;  %v705_v34 = vld [vmem:[%s1289_s2 + $0x48] sm:$0xff] }
 0x42d   :  { %v867_v63 = vunpack.i.l.bf16 %v866_v60  ;;  %v434_v0 = vsel %vm431_vm14, %v433_v31, %v429_v61  ;;  %v868_v11 = vunpack.i.h.bf16 %v866_v60  ;;  %v532_v23 = vsel %vm531_vm6, %v1141_v47, %v528_v52  ;;  %vm546_vm11 = vmor %vm544_vm10, %vm545_vm9  ;;  %v709_v52 = vld [vmem:[%s1289_s2 + $0x68] sm:$0xff] }
 0x42e   :  { %v435_v3 = vmul.f32 %v1118_v10, %v434_v0  ;;  %v873_v10 = vunpack.i.h.bf16 %v871_v62  ;;  %v541_v17 = vsub.f32 1.0, %v540_v18  ;;  %v537_v30 = vsel %vm534_vm8, %v536_v29, %v532_v23  ;;  %717 = vmatpush.msra.mxu3 %v709_v52 }
 0x42f   :  { %340 = vmatpush.msrb.mxu1 %v867_v63  ;;  %v538_v36 = vmul.f32 %v1114_v7, %v537_v30  ;;  %vm549_vm12 = vcmp.eq.f32.partialorder %v548_v25, 8.507059e+37  ;;  %v593_v7 = vperm.slane %v1184_v41, 1  ;;  %v907_v59 = vpop.eup %906  ;;  %v706_v30 = vld [vmem:[%s1289_s2 + $0x50] sm:$0xff]  ;;  %v704_v25 = vld [vmem:[%s1289_s2 + $0x40] sm:$0xff] }
 0x430   :  { %834 = vmatmul.msk.f32.gmra.mxu3 %vm143_vm7, %v435_v3  ;;  %v542_v26 = vmul.f32 %v905_v8, %v541_v17 }
 0x431   :  { %341 = vmatpush.msrb.mxu1 %v868_v11  ;;  %650 = vrot.lane.b32.xlu2 %v593_v7, %s942_s27  ;;  %v663_v11 = vld [vmem:[%s1288_s1 + $0x48] sm:$0xff] }
 0x432   :  { %827 = vmatmul.msk.f32.vlgmr.msrb.gmra.mxu1 %vm143_vm7, %v176_v14  ;;  %v543_v32 = vadd.f32 %v905_v8, %v542_v26  ;;  %683 = vmatpush.msra.mxu2 %v663_v11  ;;  %v661_v14 = vld [vmem:[%s1288_s1 + $0x18] sm:$0xff] }
 0x433   :  { %582 = vmatpush.msra.mxu1 %v872_v13  ;;  %v662_v13 = vld [vmem:[%s1288_s1 + $0x30] sm:$0xff]  ;;  %v707_v26 = vld [vmem:[%s1289_s2 + $0x58] sm:$0xff]  ;;  %718 = vmatpush.msra.mxu3 %v708_v22  ;;  %v784_v22 = vperm.slane %v1184_v41, 2  ;;  %s801_s1 = sshll.u32 %s1291_s4, 4  ;;  %s802_s1 = int_to_ptr.hbm [resolvable:$true] %s801_s1 }
 0x434   :  { %v547_v49 = vsel %vm546_vm11, %v905_v8, %v543_v32  ;;  %684 = vmatpush.msra.mxu2 %v662_v13 }
 0x435   :  { %583 = vmatpush.msra.mxu1 %v873_v10  ;;  %v552_v39 = vsel %vm549_vm12, %v551_v37, %v547_v49  ;;  %719 = vmatpush.msra.mxu3 %v707_v26 }
 0x436   :  { %v553_v40 = vmul.f32 %v1122_v12, %v552_v39  ;;  %685 = vmatpush.msra.mxu2 %v661_v14 }
 0x437   :  { %720 = vmatpush.msra.mxu3 %v706_v30 }
 0x438   :  { %686 = vmatpush.msra.mxu2 %v660_v15 }
 0x439   :  { %712 = vrot.lane.b32.xlu2 %v593_v7, %s947_s30  ;;  %721 = vmatpush.msra.mxu3 %v705_v34 }
 0x43a   :  { %828 = vmatmul.msk.f32.gmra.mxu1 %vm143_vm7, %v191_v24 }
 0x43b   :  { %722 = vmatpush.msra.mxu3 %v704_v25 }
 0x442   :  { %839 = vmatmul.msk.f32.vlgmr.msra.gmra.mxu1 %vm143_vm7, %v538_v36 }
 0x44a   :  { %840 = vmatmul.msk.f32.gmra.mxu1 %vm143_vm7, %v553_v40  ;;  %vm609_vm7 = vweird.f32 %v907_v59  ;;  %v703_v40 = vld [vmem:[%s1289_s2 + $0x38] sm:$0xff] }
 0x44b   :  { %723 = vmatpush.msra.mxu3 %v703_v40 }
 0x4ab   :  { %v459_v45 = vpop.f32.mrf.mxu3 }
 0x4af   :  { %v343_v42 = vpop.f32.mrf.mxu1 }
 0x4b0   :  { %v344_v44 = vadd.f32 %v343_v42, %v1081_v28  ;;  %v651_v42 = vpop.permute.xlu2 %650 }
 0x4b2   :  { %v465_v46 = vadd.f32 %v459_v45, %v344_v44  ;;  %v702_v44 = vld [vmem:[%s1289_s2 + $0x30] sm:$0xff] }
 0x4b3   :  { %v462_v51 = vpop.f32.mrf.mxu3  ;;  %724 = vmatpush.msra.mxu3 %v702_v44 }
 0x4b7   :  { %v346_v43 = vpop.f32.mrf.mxu1 }
 0x4b8   :  { %v347_v47 = vadd.f32 %v346_v43, %v1091_v33  ;;  %v605_v33 = vmul.f32 32.0, %v907_v59 }
 0x4ba   :  { %v466_v53 = vadd.f32 %v462_v51, %v347_v47  ;;  %v606_v31 = vsub.f32 1.0, %v605_v33  ;;  %v664_v33 = vperm.slane %v1184_v41, 0 }
 0x4bc   :  { %v607_v60 = vmul.f32 %v907_v59, %v606_v31 }
 0x4bf   :  { %v585_v12 = vpop.f32.mrf.mxu1 }
 0x4c0   :  { %v591_v38 = vadd.f32 %v585_v12, %v465_v46  ;;  %v701_v12 = vld [vmem:[%s1289_s2 + $0x28] sm:$0xff] }
 0x4c1   :  { %725 = vmatpush.msra.mxu3 %v701_v12 }
 0x4c2   :  { %v594_v48 = vadd.f32 %v593_v7, %v591_v38 }
 0x4c4   :  { %v596_v50 = vadd.f32 %v594_v48, %v996_v4  ;;  %v608_v4 = vadd.f32 %v907_v59, %v607_v60  ;;  %v700_v48 = vld [vmem:[%s1289_s2 + $0x20] sm:$0xff] }
 0x4c5   :  { %726 = vmatpush.msra.mxu3 %v700_v48 }
 0x4c6   :  { %v598_v27 = vsel %vm48_vm0, %v596_v50, 0.0  ;;  %v1195_v61 = vsel %vm609_vm7, %v907_v59, %v608_v4  ;;  %v696_v59 = vld [vmem:[%s1289_s2] sm:$0xff] }
 0x4c7   :  { %599 = vadd.xlane.f32.xlu0 %v598_v27  ;;  %v588_v54 = vpop.f32.mrf.mxu1 }
 0x4c8   :  { %v592_v55 = vadd.f32 %v588_v54, %v466_v53  ;;  %v699_v53 = vld [vmem:[%s1289_s2 + $0x18] sm:$0xff] }
 0x4c9   :  { %727 = vmatpush.msra.mxu3 %v699_v53 }
 0x4ca   :  { %v595_v56 = vadd.f32 %v593_v7, %v592_v55 }
 0x4cc   :  { %v597_v57 = vadd.f32 %v595_v56, %v1003_v5 }
 0x4ce   :  { %v601_v28 = vsel %vm48_vm0, %v597_v57, 0.0 }
 0x4cf   :  { %602 = vadd.xlane.f32.xlu0 %v601_v28  ;;  %v698_v28 = vld [vmem:[%s1289_s2 + $0x10] sm:$0xff]  ;;  %s953_s2 = smov [#allocation2]  }
 0x4d0   :  { %728 = vmatpush.msra.mxu3 %v698_v28 }
 0x4d2   :  { %729 = vmatpush.msra.mxu3 %v697_v58 }
 0x4d4   :  { %730 = vmatpush.msra.mxu3 %v696_v59 }
 0x53a   :  { %v600_v62 = vpop.xlane.xlu0 %599 }
 0x53b   :  { %v611_v63 = vmul.f32 %v1195_v61, %v600_v62 }
 0x53d   :  { %v613_v0 = vsub.f32 %v596_v50, %v611_v63 }
 0x53f   :  { %v615_v1 = vmul.f32 %v613_v0, %v613_v0 }
 0x541   :  { %v617_v5 = vsel %vm48_vm0, %v615_v1, 0.0  ;;  %v713_v1 = vpop.permute.xlu2 %712 }
 0x542   :  { %618 = vadd.xlane.f32.xlu1 %v617_v5  ;;  %v603_v2 = vpop.xlane.xlu0 %602 }
 0x543   :  { %v612_v3 = vmul.f32 %v1195_v61, %v603_v2 }
 0x545   :  { %v1200_v6 = vsub.f32 %v597_v57, %v612_v3 }
 0x547   :  { %v616_v8 = vmul.f32 %v1200_v6, %v1200_v6 }
 0x549   :  { %v620_v9 = vsel %vm48_vm0, %v616_v8, 0.0 }
 0x54a   :  { %621 = vadd.xlane.f32.xlu0 %v620_v9 }
 0x55e   :  { %655 = vrot.lane.b32.xlu0 %v593_v7, %s951_s16 }
 0x5b5   :  { %v619_v10 = vpop.xlane.xlu1 %618 }
 0x5b6   :  { %v623_v16 = vmul.f32 %v619_v10, %v1195_v61 }
 0x5b8   :  { %v625_v18 = vadd.f32 1e-05, %v623_v16 }
 0x5ba   :  { %908 = vrsqrt.f32 %v625_v18  ;;  %vm633_vm14 = vweird.f32 %v625_v18 }
 0x5bd   :  { %v622_v21 = vpop.xlane.xlu0 %621 }
 0x5be   :  { %v624_v17 = vmul.f32 %v622_v21, %v1195_v61 }
 0x5c0   :  { %v909_v35 = vpop.eup %908  ;;  %v626_v24 = vadd.f32 1e-05, %v624_v17 }
 0x5c1   :  { %v628_v23 = vmul.f32 %v909_v35, %v625_v18  ;;  %vm634_vm13 = vweird.f32 %v909_v35 }
 0x5c2   :  { %910 = vrsqrt.f32 %v626_v24  ;;  %vm635_vm15 = vmor %vm633_vm14, %vm634_vm13  ;;  %vm643_vm1 = vweird.f32 %v626_v24 }
 0x5c3   :  { %v629_v29 = vmul.f32 %v909_v35, %v628_v23 }
 0x5c5   :  { %v630_v32 = vmul.f32 0.5, %v629_v29 }
 0x5c7   :  { %v631_v36 = vsub.f32 1.5, %v630_v32 }
 0x5c8   :  { %v911_v49 = vpop.eup %910 }
 0x5c9   :  { %v638_v37 = vmul.f32 %v911_v49, %v626_v24  ;;  %v632_v39 = vmul.f32 %v909_v35, %v631_v36  ;;  %vm644_vm2 = vweird.f32 %v911_v49 }
 0x5ca   :  { %vm645_vm3 = vmor %vm643_vm1, %vm644_vm2 }
 0x5cb   :  { %v639_v7 = vmul.f32 %v911_v49, %v638_v37  ;;  %v636_v43 = vsel %vm635_vm15, %v909_v35, %v632_v39 }
 0x5cc   :  { %v647_v45 = vmul.f32 %v636_v43, %v613_v0 }
 0x5cd   :  { %v640_v46 = vmul.f32 0.5, %v639_v7 }
 0x5ce   :  { %v653_v38 = vmul.f32 %v651_v42, %v647_v45 }
 0x5cf   :  { %v641_v47 = vsub.f32 1.5, %v640_v46 }
 0x5d0   :  { %v656_v50 = vpop.permute.xlu0 %655 }
 0x5d1   :  { %v642_v51 = vmul.f32 %v911_v49, %v641_v47  ;;  %v658_v27 = vadd.f32 %v656_v50, %v653_v38 }
 0x5d3   :  { %v646_v54 = vsel %vm645_vm3, %v911_v49, %v642_v51  ;;  %841 = vmatmul.msk.f32.vlgmr.msra.gmra.mxu2 %vm48_vm0, %v658_v27 }
 0x5d4   :  { %v648_v55 = vmul.f32 %v646_v54, %v1200_v6 }
 0x5d6   :  { %v654_v56 = vmul.f32 %v651_v42, %v648_v55 }
 0x5d8   :  { %v659_v57 = vadd.f32 %v656_v50, %v654_v56 }
 0x5db   :  { %842 = vmatmul.msk.f32.gmra.mxu2 %vm48_vm0, %v659_v57 }
 0x656   :  { %v688_v31 = vpop.f32.mrf.mxu2 }
 0x657   :  { %v689_v60 = vadd.f32 %v688_v31, %v664_v33 }
 0x659   :  { %v694_v4 = vmax.f32 %v689_v60, 0.0 }
 0x65b   :  { %731 = vmatmul.f32.vlgmr.msra.gmra.mxu3 %v694_v4 }
 0x65e   :  { %v691_v62 = vpop.f32.mrf.mxu2 }
 0x65f   :  { %v692_v63 = vadd.f32 %v691_v62, %v664_v33 }
 0x661   :  { %v695_v0 = vmax.f32 %v692_v63, 0.0 }
 0x663   :  { %734 = vmatmul.f32.gmra.mxu3 %v695_v0 }
 0x6de   :  { %v732_v5 = vpop.f32.mrf.mxu3 }
 0x6df   :  { %v733_v2 = vadd.f32 %v732_v5, %v713_v1 }
 0x6e1   :  { %v738_v3 = vadd.f32 %v733_v2, %v658_v27 }
 0x6e3   :  { %v740_v6 = vsel %vm48_vm0, %v738_v3, 0.0 }
 0x6e4   :  { %741 = vadd.xlane.f32.xlu2 %v740_v6 }
 0x6e6   :  { %v735_v8 = vpop.f32.mrf.mxu3 }
 0x6e7   :  { %v736_v9 = vadd.f32 %v735_v8, %v713_v1 }
 0x6e9   :  { %v739_v11 = vadd.f32 %v736_v9, %v659_v57 }
 0x6eb   :  { %v743_v13 = vsel %vm48_vm0, %v739_v11, 0.0 }
 0x6ec   :  { %744 = vadd.xlane.f32.xlu0 %v743_v13 }
 0x757   :  { %v742_v14 = vpop.xlane.xlu2 %741 }
 0x758   :  { %v746_v15 = vmul.f32 %v742_v14, %v1195_v61 }
 0x75a   :  { %v748_v10 = vsub.f32 %v738_v3, %v746_v15 }
 0x75c   :  { %v750_v16 = vmul.f32 %v748_v10, %v748_v10 }
 0x75e   :  { %v752_v18 = vsel %vm48_vm0, %v750_v16, 0.0 }
 0x75f   :  { %v745_v19 = vpop.xlane.xlu0 %744  ;;  %753 = vadd.xlane.f32.xlu1 %v752_v18 }
 0x760   :  { %v747_v20 = vmul.f32 %v745_v19, %v1195_v61 }
 0x762   :  { %v749_v21 = vsub.f32 %v739_v11, %v747_v20 }
 0x764   :  { %v751_v52 = vmul.f32 %v749_v21, %v749_v21 }
 0x766   :  { %v755_v17 = vsel %vm48_vm0, %v751_v52, 0.0 }
 0x767   :  { %756 = vadd.xlane.f32.xlu1 %v755_v17 }
 0x780   :  { %788 = vrot.lane.b32.xlu1 %v784_v22, %s942_s27  ;;  %s799_s27 = sshll.u32 %s953_s2, 4  ;;  %s800_s27 = int_to_ptr.vmem [resolvable:$true] %s799_s27 }
 0x7d2   :  { %v754_v35 = vpop.xlane.xlu1 %753 }
 0x7d3   :  { %v758_v24 = vmul.f32 %v754_v35, %v1195_v61 }
 0x7d5   :  { %v760_v23 = vadd.f32 1e-05, %v758_v24 }
 0x7d7   :  { %912 = vrsqrt.f32 %v760_v23  ;;  %vm768_vm5 = vweird.f32 %v760_v23 }
 0x7da   :  { %v757_v26 = vpop.xlane.xlu1 %756 }
 0x7db   :  { %v759_v29 = vmul.f32 %v757_v26, %v1195_v61 }
 0x7dd   :  { %v913_v30 = vpop.eup %912  ;;  %v761_v32 = vadd.f32 1e-05, %v759_v29 }
 0x7de   :  { %v763_v34 = vmul.f32 %v913_v30, %v760_v23  ;;  %vm769_vm4 = vweird.f32 %v913_v30 }
 0x7df   :  { %914 = vrsqrt.f32 %v761_v32  ;;  %vm770_vm6 = vmor %vm768_vm5, %vm769_vm4  ;;  %vm778_vm9 = vweird.f32 %v761_v32 }
 0x7e0   :  { %v764_v36 = vmul.f32 %v913_v30, %v763_v34 }
 0x7e2   :  { %v765_v25 = vmul.f32 0.5, %v764_v36 }
 0x7e4   :  { %v766_v49 = vsub.f32 1.5, %v765_v25 }
 0x7e5   :  { %v915_v37 = vpop.eup %914 }
 0x7e6   :  { %v773_v41 = vmul.f32 %v915_v37, %v761_v32  ;;  %v767_v39 = vmul.f32 %v913_v30, %v766_v49  ;;  %vm779_vm8 = vweird.f32 %v915_v37 }
 0x7e7   :  { %vm780_vm10 = vmor %vm778_vm9, %vm779_vm8 }
 0x7e8   :  { %v774_v40 = vmul.f32 %v915_v37, %v773_v41  ;;  %v771_v42 = vsel %vm770_vm6, %v913_v30, %v767_v39 }
 0x7e9   :  { %v782_v44 = vmul.f32 %v771_v42, %v748_v10 }
 0x7ea   :  { %v775_v7 = vmul.f32 0.5, %v774_v40 }
 0x7eb   :  { %v785_v12 = vmul.f32 %v784_v22, %v782_v44 }
 0x7ec   :  { %v776_v43 = vsub.f32 1.5, %v775_v7 }
 0x7ee   :  { %v777_v61 = vmul.f32 %v915_v37, %v776_v43 }
 0x7f0   :  { %v781_v45 = vsel %vm780_vm10, %v915_v37, %v777_v61 }
 0x7f1   :  { %v783_v46 = vmul.f32 %v781_v45, %v749_v21 }
 0x7f2   :  { %v789_v38 = vpop.permute.xlu1 %788 }
 0x7f3   :  { %v786_v47 = vmul.f32 %v784_v22, %v783_v46  ;;  %v791_v48 = vadd.f32 %v789_v38, %v785_v12 }
 0x7f5   :  { %v792_v50 = vadd.f32 %v789_v38, %v786_v47  ;;  %793 = vst.msk [vmem:[#allocation2] sm:$0xff] %vm48_vm0, %v791_v48 }
 0x7f7   :  { %794 = vst.msk [vmem:[#allocation2 + $0x8] sm:$0xff] %vm48_vm0, %v792_v50 }
 0x7f8   :  { %807 = dma.vmem_to_hbm [thread:$0]  %s800_s27, 256, %s802_s1, [#allocation3], %s954_s6, %s954_s6, %s955_s7  }
 0x7f9   :  { %940 = dma.done.wait [#allocation3], 256  }
 0x7fa   :  { %941 = vsyncadd [#allocation3], 4294967040 }
 0x7fb   :  { %812 = vsyncpa [#allocation3], 1 }

</bundles_post_ra>
